<compile_context>
chip_gen: v5e
topology: v5e:2x2
jax: 0.10.0
libtpu: 0.0.40
codegen_flags: <defaults>
</compile_context>

<pallas_src>
import functools
import math

import numpy as np
import jax
import jax.numpy as jnp
from jax import lax
from jax.experimental import pallas as pl
from jax.experimental.pallas import tpu as pltpu


def _msa_kernel(*refs, B, T, D, scale, has_bias):
    if has_bias:
        x_ref, w_ref, b_ref, ctx_ref, scores_ref = refs
    else:
        x_ref, w_ref, ctx_ref, scores_ref = refs
        b_ref = None

    # ---- fused QKV projection: one lane-dense MXU matmul over all B*T rows ----
    # x_ref: (B*T, d_in) bf16, w_ref: (d_in, 3D) bf16 -> f32 accumulation
    qkv = jnp.dot(x_ref[...], w_ref[...], preferred_element_type=jnp.float32)
    if b_ref is not None:                      # gated at trace time (qkv_bias)
        qkv = qkv + b_ref[...].astype(jnp.float32)

    # causal mask built once (shared by every batch element)
    row = lax.broadcasted_iota(jnp.int32, (T, T), 0)
    col = lax.broadcasted_iota(jnp.int32, (T, T), 1)
    causal = col <= row

    # Unrolled per-batch attention (B is tiny; see TODO for large-B grid axis).
    for b in range(B):
        qkv_b = qkv[b * T:(b + 1) * T]         # static slice, (T, 3D)
        q = qkv_b[:, 0 * D:1 * D]
        k = qkv_b[:, 1 * D:2 * D]
        v = qkv_b[:, 2 * D:3 * D]

        # scaled scores: contract on D axis (no explicit K transpose), f32 / HIGHEST
        s = lax.dot_general(q, k, (((1,), (1,)), ((), ())),
                            preferred_element_type=jnp.float32,
                            precision=lax.Precision.HIGHEST) * scale
        s = jnp.where(causal, s, -jnp.inf)     # strictly-upper triangle -> -inf

        # module returns the MASKED scores (masked_fill_ happens before softmax)
        scores_ref[b] = s.astype(scores_ref.dtype)

        # numerically stable softmax over keys, exact divide (matches torch)
        m = jnp.max(s, axis=-1, keepdims=True)
        e = jnp.exp(s - m)
        attn = e / jnp.sum(e, axis=-1, keepdims=True)

        # context vectors (dropout omitted: eval semantics)
        ctx = lax.dot_general(attn, v, (((1,), (0,)), ((), ())),
                              preferred_element_type=jnp.float32,
                              precision=lax.Precision.HIGHEST)
        ctx_ref[b] = ctx.astype(ctx_ref.dtype)


def masked_self_attention(x, w_proj, b_proj=None):
    """x: (B, T, d_in) f32; w_proj: (d_in, 3*attn_dim); b_proj: (3*attn_dim,) or None.

    Returns (context_vec (B, T, attn_dim) f32, masked attn_scores (B, T, T) f32)."""
    B, T, d_in = x.shape
    D3 = w_proj.shape[1]
    D = D3 // 3
    has_bias = b_proj is not None

    # Pre-cast MXU operands to bf16 in the wrapper (halves HBM->VMEM DMA bytes for
    # weights/activations); the QKV matmul accumulates in f32 on the MXU.
    x2 = x.reshape(B * T, d_in).astype(jnp.bfloat16)
    w = w_proj.astype(jnp.bfloat16)

    in_specs = [
        pl.BlockSpec((B * T, d_in), lambda i: (0, 0)),
        pl.BlockSpec((d_in, D3), lambda i: (0, 0)),
    ]
    args = [x2, w]
    if has_bias:
        b2 = jnp.asarray(b_proj, jnp.float32).reshape(1, D3)
        in_specs.append(pl.BlockSpec((1, D3), lambda i: (0, 0)))
        args.append(b2)

    # VMEM request derived from the actual working set (inputs + outputs, with
    # generous headroom for double buffering / padding), not a hardcoded blanket.
    raw_bytes = (x2.size * 2 + w.size * 2
                 + B * T * D * 4 + B * T * T * 4
                 + (D3 * 4 if has_bias else 0))
    vmem_limit = max(16 * 1024 * 1024, 4 * int(raw_bytes))

    kernel = functools.partial(_msa_kernel, B=B, T=T, D=D,
                               scale=1.0 / math.sqrt(D), has_bias=has_bias)

    return pl.pallas_call(
        kernel,
        out_shape=(jax.ShapeDtypeStruct((B, T, D), jnp.float32),
                   jax.ShapeDtypeStruct((B, T, T), jnp.float32)),
        # Single grid step: at B=2/T=8 the work is fixed-overhead bound, so batch is
        # folded into one invocation (one QKV matmul, one weight fetch).
        grid=(1,),
        in_specs=in_specs,
        out_specs=(
            pl.BlockSpec((B, T, D), lambda i: (0, 0, 0)),
            pl.BlockSpec((B, T, T), lambda i: (0, 0, 0)),
        ),
        compiler_params=pltpu.CompilerParams(
            dimension_semantics=("arbitrary",),
            vmem_limit_bytes=vmem_limit),
    )(*args)


# pure-JAX f32 reference for a sanity check
def reference(x, w_proj, b_proj=None):
    qkv = jnp.einsum('btd,de->bte', x, w_proj)
    if b_proj is not None:
        qkv = qkv + b_proj
    D = w_proj.shape[1] // 3
    q, k, v = qkv[..., :D], qkv[..., D:2 * D], qkv[..., 2 * D:]
    s = jnp.einsum('bqe,bke->bqk', q, k) / math.sqrt(D)
    T = x.shape[1]
    mask = jnp.triu(jnp.ones((T, T), dtype=bool), k=1)
    s = jnp.where(mask[None], -jnp.inf, s)
    attn = jax.nn.softmax(s, axis=-1)
    ctx = jnp.einsum('bqk,bke->bqe', attn, v)
    return ctx, s


if __name__ == "__main__":
    # small config consistent with the module:
    # batch=2, seq=context_length=8, d_in=32, attn_dim=16, qkv_bias=False
    B, T, d_in, attn_dim = 2, 8, 32, 16

    key = jax.random.PRNGKey(0)
    kx, kw = jax.random.split(key, 2)

    w_proj = (jax.random.normal(kw, (d_in, 3 * attn_dim), jnp.float32)
              * (1.0 / math.sqrt(d_in)))
    x = jax.random.normal(kx, (B, T, d_in), jnp.float32)

    # qkv_bias=False (config default) -> bias path skipped at trace time
    ctx, scores = masked_self_attention(x, w_proj, b_proj=None)
    ctx = jax.block_until_ready(ctx)
    scores = jax.block_until_ready(scores)

    ctx_exp, scores_exp = reference(x, w_proj, b_proj=None)
    assert ctx.shape == (B, T, attn_dim)
    assert scores.shape == (B, T, T)
    # q@k^T, softmax and attn@v run in f32 / exact divide; the residual error vs the
    # pure-f32 reference comes from the wrapper-side bf16 pre-cast of x / w_proj
    # (a deliberate DMA/MXU optimization), so keep a bf16-scale tolerance.
    np.testing.assert_allclose(np.asarray(ctx), np.asarray(ctx_exp),
                               rtol=5e-2, atol=5e-2)
    np.testing.assert_allclose(np.asarray(scores), np.asarray(scores_exp),
                               rtol=5e-2, atol=5e-2)

    print("KERNEL_OK")
</pallas_src>

<mosaic_0001>
module attributes {stable_mosaic.version = 11 : i64} {
  func.func @_msa_kernel(%arg0: i32, %arg1: memref<16x32xbf16, #tpu.memory_space<vmem>>, %arg2: memref<32x48xbf16, #tpu.memory_space<vmem>>, %arg3: memref<2x8x16xf32, #tpu.memory_space<vmem>>, %arg4: memref<2x8x8xf32, #tpu.memory_space<vmem>>) attributes {dimension_semantics = [#tpu.dimension_semantics<arbitrary>], iteration_bounds = array<i64: 1>, scalar_prefetch = 0 : i64, scratch_operands = 0 : i64, tpu.core_type = #tpu.core_type<tc>, window_params = [{pipeline_mode = #tpu.pipeline_mode<synchronous>, transform_indices = @transform_0, window_bounds = array<i64: 16, 32>}, {pipeline_mode = #tpu.pipeline_mode<synchronous>, transform_indices = @transform_1, window_bounds = array<i64: 32, 48>}, {pipeline_mode = #tpu.pipeline_mode<synchronous>, transform_indices = @transform_2, window_bounds = array<i64: 2, 8, 16>}, {pipeline_mode = #tpu.pipeline_mode<synchronous>, transform_indices = @transform_3, window_bounds = array<i64: 2, 8, 8>}]} {
    %c0 = arith.constant 0 : index
    %c0_0 = arith.constant 0 : index
    %0 = vector.load %arg1[%c0, %c0_0] : memref<16x32xbf16, #tpu.memory_space<vmem>>, vector<16x32xbf16>
    %c0_1 = arith.constant 0 : index
    %c0_2 = arith.constant 0 : index
    %1 = vector.load %arg2[%c0_1, %c0_2] : memref<32x48xbf16, #tpu.memory_space<vmem>>, vector<32x48xbf16>
    %cst = arith.constant dense<0.000000e+00> : vector<16x48xf32>
    %2 = tpu.matmul %0, %1, %cst {dimension_numbers = #tpu.dot_dimension_numbers<[1], [0], [0], [1], [0, 0, 1, 1], [], []>} : vector<16x32xbf16>, vector<32x48xbf16>, vector<16x48xf32> -> vector<16x48xf32>
    %3 = tpu.iota {dimensions = array<i32: 0>} : vector<8x8xi32>
    %4 = tpu.iota {dimensions = array<i32: 1>} : vector<8x8xi32>
    %5 = arith.cmpi sle, %4, %3 : vector<8x8xi32>
    %6 = vector.extract_strided_slice %2 {offsets = [0, 0], sizes = [8, 48], strides = [1, 1]} : vector<16x48xf32> to vector<8x48xf32>
    %7 = vector.extract_strided_slice %6 {offsets = [0, 0], sizes = [8, 16], strides = [1, 1]} : vector<8x48xf32> to vector<8x16xf32>
    %8 = vector.extract_strided_slice %6 {offsets = [0, 16], sizes = [8, 16], strides = [1, 1]} : vector<8x48xf32> to vector<8x16xf32>
    %9 = vector.extract_strided_slice %6 {offsets = [0, 32], sizes = [8, 16], strides = [1, 1]} : vector<8x48xf32> to vector<8x16xf32>
    %cst_3 = arith.constant dense<0.000000e+00> : vector<8x8xf32>
    %10 = tpu.matmul %7, %8, %cst_3 {dimension_numbers = #tpu.dot_dimension_numbers<[1], [1], [0], [0], [0, 0, 1, 0], [], []>, precision = #tpu.contract_precision<fp32>} : vector<8x16xf32>, vector<8x16xf32>, vector<8x8xf32> -> vector<8x8xf32>
    %cst_4 = arith.constant 2.500000e-01 : f32
    %11 = vector.broadcast %cst_4 : f32 to vector<8x8xf32>
    %12 = arith.mulf %10, %11 : vector<8x8xf32>
    %cst_5 = arith.constant 0xFF800000 : f32
    %13 = vector.broadcast %cst_5 : f32 to vector<8x8xf32>
    %14 = arith.select %5, %12, %13 : vector<8x8xi1>, vector<8x8xf32>
    %c0_6 = arith.constant 0 : index
    %c0_7 = arith.constant 0 : index
    %c0_8 = arith.constant 0 : index
    %15 = vector.load %arg4[%c0_6, %c0_7, %c0_8] : memref<2x8x8xf32, #tpu.memory_space<vmem>>, vector<1x8x8xf32>
    %16 = vector.shape_cast %15 : vector<1x8x8xf32> to vector<8x8xf32>
    %17 = vector.shape_cast %14 : vector<8x8xf32> to vector<1x8x8xf32>
    tpu.vector_store %arg4[%c0_6, %c0_7, %c0_8], %17 {strides = array<i32>} : memref<2x8x8xf32, #tpu.memory_space<vmem>>, vector<1x8x8xf32>,
    %cst_9 = arith.constant dense<0xFF800000> : vector<8xf32>
    %18 = vector.multi_reduction <maximumf>, %14, %cst_9 [1] : vector<8x8xf32> to vector<8xf32>
    %19 = vector.shape_cast %18 : vector<8xf32> to vector<8x1xf32>
    %20 = vector.broadcast %19 : vector<8x1xf32> to vector<8x8xf32>
    %21 = arith.subf %14, %20 : vector<8x8xf32>
    %22 = math.exp %21 : vector<8x8xf32>
    %cst_10 = arith.constant dense<0.000000e+00> : vector<8xf32>
    %23 = vector.multi_reduction <add>, %22, %cst_10 [1] : vector<8x8xf32> to vector<8xf32>
    %24 = vector.shape_cast %23 : vector<8xf32> to vector<8x1xf32>
    %25 = vector.broadcast %24 : vector<8x1xf32> to vector<8x8xf32>
    %26 = arith.divf %22, %25 : vector<8x8xf32>
    %cst_11 = arith.constant dense<0.000000e+00> : vector<8x16xf32>
    %27 = tpu.matmul %26, %9, %cst_11 {dimension_numbers = #tpu.dot_dimension_numbers<[1], [0], [0], [1], [0, 0, 1, 1], [], []>, precision = #tpu.contract_precision<fp32>} : vector<8x8xf32>, vector<8x16xf32>, vector<8x16xf32> -> vector<8x16xf32>
    %c0_12 = arith.constant 0 : index
    %c0_13 = arith.constant 0 : index
    %c0_14 = arith.constant 0 : index
    %28 = vector.load %arg3[%c0_12, %c0_13, %c0_14] : memref<2x8x16xf32, #tpu.memory_space<vmem>>, vector<1x8x16xf32>
    %29 = vector.shape_cast %28 : vector<1x8x16xf32> to vector<8x16xf32>
    %30 = vector.shape_cast %27 : vector<8x16xf32> to vector<1x8x16xf32>
    tpu.vector_store %arg3[%c0_12, %c0_13, %c0_14], %30 {strides = array<i32>} : memref<2x8x16xf32, #tpu.memory_space<vmem>>, vector<1x8x16xf32>,
    %31 = vector.extract_strided_slice %2 {offsets = [8, 0], sizes = [8, 48], strides = [1, 1]} : vector<16x48xf32> to vector<8x48xf32>
    %32 = vector.extract_strided_slice %31 {offsets = [0, 0], sizes = [8, 16], strides = [1, 1]} : vector<8x48xf32> to vector<8x16xf32>
    %33 = vector.extract_strided_slice %31 {offsets = [0, 16], sizes = [8, 16], strides = [1, 1]} : vector<8x48xf32> to vector<8x16xf32>
    %34 = vector.extract_strided_slice %31 {offsets = [0, 32], sizes = [8, 16], strides = [1, 1]} : vector<8x48xf32> to vector<8x16xf32>
    %cst_15 = arith.constant dense<0.000000e+00> : vector<8x8xf32>
    %35 = tpu.matmul %32, %33, %cst_15 {dimension_numbers = #tpu.dot_dimension_numbers<[1], [1], [0], [0], [0, 0, 1, 0], [], []>, precision = #tpu.contract_precision<fp32>} : vector<8x16xf32>, vector<8x16xf32>, vector<8x8xf32> -> vector<8x8xf32>
    %cst_16 = arith.constant 2.500000e-01 : f32
    %36 = vector.broadcast %cst_16 : f32 to vector<8x8xf32>
    %37 = arith.mulf %35, %36 : vector<8x8xf32>
    %cst_17 = arith.constant 0xFF800000 : f32
    %38 = vector.broadcast %cst_17 : f32 to vector<8x8xf32>
    %39 = arith.select %5, %37, %38 : vector<8x8xi1>, vector<8x8xf32>
    %c1 = arith.constant 1 : index
    %c0_18 = arith.constant 0 : index
    %c0_19 = arith.constant 0 : index
    %40 = vector.load %arg4[%c1, %c0_18, %c0_19] : memref<2x8x8xf32, #tpu.memory_space<vmem>>, vector<1x8x8xf32>
    %41 = vector.shape_cast %40 : vector<1x8x8xf32> to vector<8x8xf32>
    %42 = vector.shape_cast %39 : vector<8x8xf32> to vector<1x8x8xf32>
    tpu.vector_store %arg4[%c1, %c0_18, %c0_19], %42 {strides = array<i32>} : memref<2x8x8xf32, #tpu.memory_space<vmem>>, vector<1x8x8xf32>,
    %cst_20 = arith.constant dense<0xFF800000> : vector<8xf32>
    %43 = vector.multi_reduction <maximumf>, %39, %cst_20 [1] : vector<8x8xf32> to vector<8xf32>
    %44 = vector.shape_cast %43 : vector<8xf32> to vector<8x1xf32>
    %45 = vector.broadcast %44 : vector<8x1xf32> to vector<8x8xf32>
    %46 = arith.subf %39, %45 : vector<8x8xf32>
    %47 = math.exp %46 : vector<8x8xf32>
    %cst_21 = arith.constant dense<0.000000e+00> : vector<8xf32>
    %48 = vector.multi_reduction <add>, %47, %cst_21 [1] : vector<8x8xf32> to vector<8xf32>
    %49 = vector.shape_cast %48 : vector<8xf32> to vector<8x1xf32>
    %50 = vector.broadcast %49 : vector<8x1xf32> to vector<8x8xf32>
    %51 = arith.divf %47, %50 : vector<8x8xf32>
    %cst_22 = arith.constant dense<0.000000e+00> : vector<8x16xf32>
    %52 = tpu.matmul %51, %34, %cst_22 {dimension_numbers = #tpu.dot_dimension_numbers<[1], [0], [0], [1], [0, 0, 1, 1], [], []>, precision = #tpu.contract_precision<fp32>} : vector<8x8xf32>, vector<8x16xf32>, vector<8x16xf32> -> vector<8x16xf32>
    %c1_23 = arith.constant 1 : index
    %c0_24 = arith.constant 0 : index
    %c0_25 = arith.constant 0 : index
    %53 = vector.load %arg3[%c1_23, %c0_24, %c0_25] : memref<2x8x16xf32, #tpu.memory_space<vmem>>, vector<1x8x16xf32>
    %54 = vector.shape_cast %53 : vector<1x8x16xf32> to vector<8x16xf32>
    %55 = vector.shape_cast %52 : vector<8x16xf32> to vector<1x8x16xf32>
    tpu.vector_store %arg3[%c1_23, %c0_24, %c0_25], %55 {strides = array<i32>} : memref<2x8x16xf32, #tpu.memory_space<vmem>>, vector<1x8x16xf32>,
    return
  }
  func.func @transform_0(%arg0: i32) -> (i32, i32) {
    %c0_i32 = arith.constant 0 : i32
    %c0_i32_0 = arith.constant 0 : i32
    %c0_i32_1 = arith.constant 0 : i32
    return %c0_i32, %c0_i32_0 : i32, i32
  }
  func.func @transform_1(%arg0: i32) -> (i32, i32) {
    %c0_i32 = arith.constant 0 : i32
    %c0_i32_0 = arith.constant 0 : i32
    %c0_i32_1 = arith.constant 0 : i32
    return %c0_i32, %c0_i32_0 : i32, i32
  }
  func.func @transform_2(%arg0: i32) -> (i32, i32, i32) {
    %c0_i32 = arith.constant 0 : i32
    %c0_i32_0 = arith.constant 0 : i32
    %c0_i32_1 = arith.constant 0 : i32
    %c0_i32_2 = arith.constant 0 : i32
    return %c0_i32, %c0_i32_0, %c0_i32_1 : i32, i32, i32
  }
  func.func @transform_3(%arg0: i32) -> (i32, i32, i32) {
    %c0_i32 = arith.constant 0 : i32
    %c0_i32_0 = arith.constant 0 : i32
    %c0_i32_1 = arith.constant 0 : i32
    %c0_i32_2 = arith.constant 0 : i32
    return %c0_i32, %c0_i32_0, %c0_i32_1 : i32, i32, i32
  }
}

</mosaic_0001>

<bundles_post_ra>
// kernel: tpu_custom_call.1
= control target key start
LH: loop header
LB: loop body
LE: loop exit
PB: predicated region body
PF: predicated region fallthrough
CT: control target
= control target key end

     0   :  { %9 = vsyncpa [#allocation3], 0  ;;  %s1015_s0 = inlined_call_operand.hbm [shape: bf16[16,32], index: 0, kind: input, shape index: {}]   ;;  %s1016_s1 = inlined_call_operand.hbm [shape: bf16[32,48], index: 1, kind: input, shape index: {}]   ;;  %s1017_s2 = inlined_call_operand.hbm [shape: f32[2,8,16], index: 2, kind: output, shape index: {0}]   ;;  %s1018_s3 = inlined_call_operand.hbm [shape: f32[2,8,8], index: 3, kind: output, shape index: {1}]  }
   0x1   :  { %10 = vsyncpa [#allocation6], 0 }
   0x2   :  { %11 = vsyncpa [#allocation4], 0 }
   0x3   :  { %12 = vsyncpa [#allocation9], 0  ;;  %s17_s14 = sshll.u32 %s1015_s0, 4  ;;  %s940_s15 = smov [#allocation2]   ;;  %s18_s14 = int_to_ptr.hbm [resolvable:$true] %s17_s14 }
   0x4   :  { %s19_s16 = sshll.u32 %s940_s15, 4  ;;  %s30_s19 = sshll.u32 %s1016_s1, 4  ;;  %s20_s16 = int_to_ptr.vmem [resolvable:$true] %s19_s16  ;;  %s31_s19 = int_to_ptr.hbm [resolvable:$true] %s30_s19 }
   0x5   :  { %s941_s20 = smov 64   ;;  %s942_s21 = smov 4  }
   0x6   :  { %25 = dma.hbm_to_vmem [thread:$0]  %s18_s14, 128, %s20_s16, [#allocation3], %s941_s20, %s941_s20, %s942_s21  }
   0x7   :  { %s943_s22 = smov [#allocation5]  }
   0x8   :  { %s32_s23 = sshll.u32 %s943_s22, 4  ;;  %s33_s23 = int_to_ptr.vmem [resolvable:$true] %s32_s23 }
   0x9   :  { %38 = dma.hbm_to_vmem [thread:$0]  %s31_s19, 256, %s33_s23, [#allocation6], %s941_s20, %s941_s20, %s942_s21  }
   0xa   :  { %932 = dma.done.wait [#allocation3], 128  }
   0xb   :  { %933 = vsyncadd [#allocation3], 4294967168 }
   0xc   :  { %934 = dma.done.wait [#allocation6], 256  }
   0xd   :  { %935 = vsyncadd [#allocation6], 4294967040  ;;  %v817_v0 = vld [vmem:[#allocation5 + $0x8] sm:$0xff]  ;;  %v816_v1 = vld [vmem:[#allocation5] sm:$0xff]  ;;  %vm71_vm0 = vcmask 261120   ;;  %s944_s0 = smov 112   ;;  %v89_v23 = vlaneseq }
   0xe   :  { %81 = vmatpush.bf16.msra.mxu0 %v817_v0  ;;  %v815_v2 = vld [vmem:[#allocation2] sm:$0xff]  ;;  %vm97_vm1 = vcmask 130048   ;;  %vm250_vm3 = vcmask 64512   ;;  %s945_s1 = smov 96   ;;  %s946_s24 = smov [#allocation8]  }
   0xf   :  { %v981_v27 = vshrl.u32 %v89_v23, 7  ;;  %v983_v28 = vand.u32 127, %v89_v23  ;;  %s781_s25 = sshll.u32 %s946_s24, 4  ;;  %s783_s28 = sshll.u32 %s1018_s3, 4  ;;  %s782_s25 = int_to_ptr.vmem [resolvable:$true] %s781_s25  ;;  %s784_s28 = int_to_ptr.hbm [resolvable:$true] %s783_s28 }
  0x10   :  { %s947_s29 = smov 128   ;;  %s948_s30 = smov 8  }
  0x11   :  { %vm93_vm2 = vcmp.le.s32.totalorder %v983_v28, %v981_v27  ;;  %s949_s4 = smov [#allocation7]   ;;  %s770_s8 = sshll.u32 %s1017_s2, 4  ;;  %s771_s8 = int_to_ptr.hbm [resolvable:$true] %s770_s8 }
  0x12   :  { %82 = vmatpush.bf16.msra.mxu0 %v816_v1  ;;  %s768_s5 = sshll.u32 %s949_s4, 4  ;;  %s769_s5 = int_to_ptr.vmem [resolvable:$true] %s768_s5 }
  0x15   :  { %814 = vmatmul.msk.bf16.vlgmr.msra.gmra.mxu0 %vm71_vm0, %v815_v2 }
  0x92   :  { %v84_v3 = vpop.f32.mrf.mxu0 }
  0x93   :  { %95 = vrot.lane.b32.xlu0 %v84_v3, %s944_s0  ;;  %v98_v5 = vsel %vm97_vm1, %v84_v3, 0 }
  0x94   :  { %v119_v6 = vand.u32 4294901760, %v98_v5 }
  0x96   :  { %v120_v7 = vsub.f32 %v98_v5, %v119_v6 }
  0x98   :  { %v121_v8 = vand.u32 4294901760, %v120_v7 }
  0x9a   :  { %v976_v4 = vpop.f32.mrf.mxu0  ;;  %v122_v11 = vsub.f32 %v120_v7, %v121_v8 }
  0x9b   :  { %430 = vrot.lane.b32.xlu2 %v976_v4, %s944_s0  ;;  %v432_v54 = vsel %vm97_vm1, %v976_v4, 0 }
  0x9c   :  { %v123_v14 = vand.u32 4294901760, %v122_v11  ;;  %v453_v58 = vand.u32 4294901760, %v432_v54 }
  0x9e   :  { %v454_v63 = vsub.f32 %v432_v54, %v453_v58 }
  0xf5   :  { %v431_v41 = vpop.permute.xlu2 %430 }
  0xf6   :  { %v434_v43 = vsel %vm97_vm1, %v431_v41, 0 }
  0xf7   :  { %v451_v46 = vand.u32 4294901760, %v434_v43 }
  0xf9   :  { %v478_v51 = vsub.f32 %v434_v43, %v451_v46 }
  0xfb   :  { %v479_v57 = vand.u32 4294901760, %v478_v51 }
  0xfd   :  { %v480_v61 = vsub.f32 %v478_v51, %v479_v57 }
 0x105   :  { %v96_v9 = vpop.permute.xlu0 %95 }
 0x106   :  { %v100_v10 = vsel %vm97_vm1, %v96_v9, 0 }
 0x107   :  { %v117_v12 = vand.u32 4294901760, %v100_v10 }
 0x109   :  { %v144_v13 = vsub.f32 %v100_v10, %v117_v12  ;;  %118 = vmatpush.xpose.msra.mxu1 %v117_v12 }
 0x10b   :  { %171 = vmatpush.xpose.msra.mxu3 %v144_v13  ;;  %v145_v15 = vand.u32 4294901760, %v144_v13 }
 0x10c   :  { %124 = vmatmul.f32.vlgmr.msra.gmra.mxu1 %v123_v14 }
 0x10d   :  { %194 = vmatpush.xpose.msrb.mxu1 %v117_v12  ;;  %v146_v16 = vsub.f32 %v144_v13, %v145_v15 }
 0x10e   :  { %174 = vmatmul.f32.vlgmr.msra.gmra.mxu3 %v120_v7  ;;  %v455_v7 = vand.u32 4294901760, %v454_v63 }
 0x10f   :  { %242 = vmatpush.xpose.msrb.mxu3 %v117_v12  ;;  %v147_v17 = vand.u32 4294901760, %v146_v16 }
 0x110   :  { %v456_v11 = vsub.f32 %v454_v63, %v455_v7 }
 0x111   :  { %148 = vmatpush.xpose.msra.mxu2 %v147_v17 }
 0x112   :  { %v457_v13 = vand.u32 4294901760, %v456_v11 }
 0x114   :  { %150 = vmatmul.f32.vlgmr.msra.gmra.mxu2 %v119_v6  ;;  %198 = vmatmul.f32.vlgmr.msrb.gmra.mxu1 %v121_v8 }
 0x115   :  { %220 = vmatpush.xpose.msrb.mxu2 %v145_v15 }
 0x116   :  { %244 = vmatmul.f32.vlgmr.msrb.gmra.mxu3 %v119_v6 }
 0x11c   :  { %222 = vmatmul.f32.vlgmr.msrb.gmra.mxu2 %v119_v6 }
 0x189   :  { %v125_v18 = vpop.f32.mrf.mxu1 }
 0x191   :  { %v175_v19 = vpop.f32.mrf.mxu3  ;;  %v199_v24 = vpop.f32.mrf.mxu1 }
 0x197   :  { %v151_v20 = vpop.f32.mrf.mxu2 }
 0x198   :  { %v152_v21 = vadd.f32 %v151_v20, %v125_v18 }
 0x199   :  { %v245_v30 = vpop.f32.mrf.mxu3 }
 0x19a   :  { %v176_v22 = vadd.f32 %v175_v19, %v152_v21 }
 0x19c   :  { %v200_v25 = vadd.f32 %v199_v24, %v176_v22 }
 0x19f   :  { %v223_v26 = vpop.f32.mrf.mxu2 }
 0x1a0   :  { %v224_v29 = vadd.f32 %v223_v26, %v200_v25 }
 0x1a2   :  { %v246_v31 = vadd.f32 %v245_v30, %v224_v29 }
 0x1a4   :  { %v248_v32 = vmul.f32 0.25, %v246_v31 }
 0x1a6   :  { %v249_v33 = vsel %vm93_vm2, %v248_v32, -inf }
 0x1a7   :  { %v252_v34 = vsel %vm250_vm3, %v249_v33, -inf  ;;  %251 = vst.msk [vmem:[#allocation8] sm:$0xff] %vm250_vm3, %v249_v33 }
 0x1a8   :  { %253 = vmax.xlane.f32.xlu0 %v252_v34 }
 0x21b   :  { %v254_v35 = vpop.xlane.xlu0 %253 }
 0x21c   :  { %v255_v36 = vsub.f32 %v249_v33, %v254_v35 }
 0x21e   :  { %v256_v37 = vmul.f32 1.442695, %v255_v36 }
 0x220   :  { %828 = vpow2.f32 %v256_v37 }
 0x226   :  { %v829_v38 = vpop.eup %828 }
 0x227   :  { %v258_v39 = vsel %vm250_vm3, %v829_v38, 0.0 }
 0x228   :  { %259 = vadd.xlane.f32.xlu1 %v258_v39 }
 0x241   :  { %276 = vrot.lane.b32.xlu1 %v84_v3, %s945_s1  ;;  %v481_v3 = vand.u32 4294901760, %v480_v61 }
 0x29b   :  { %v260_v40 = vpop.xlane.xlu1 %259 }
 0x29c   :  { %830 = vrcp.f32 %v260_v40  ;;  %v272_v47 = vand.u32 2147483648, %v260_v40  ;;  %v270_v49 = vand.u32 2147483647, %v260_v40  ;;  %vm266_vm5 = vweird.f32 %v260_v40 }
 0x29e   :  { %v273_v52 = vor.u32 1.1754944e-38, %v272_v47  ;;  %vm271_vm7 = vcmp.eq.f32.partialorder %v270_v49, 8.507059e+37 }
 0x2a2   :  { %v831_v42 = vpop.eup %830 }
 0x2a3   :  { %v262_v44 = vmul.f32 %v831_v42, %v260_v40  ;;  %vm267_vm4 = vweird.f32 %v831_v42 }
 0x2a4   :  { %vm268_vm6 = vmor %vm266_vm5, %vm267_vm4 }
 0x2a5   :  { %v263_v45 = vsub.f32 1.0, %v262_v44 }
 0x2a7   :  { %v264_v48 = vmul.f32 %v831_v42, %v263_v45 }
 0x2a9   :  { %v265_v50 = vadd.f32 %v831_v42, %v264_v48 }
 0x2ab   :  { %v269_v53 = vsel %vm268_vm6, %v831_v42, %v265_v50 }
 0x2ac   :  { %v274_v55 = vsel %vm271_vm7, %v273_v52, %v269_v53 }
 0x2ad   :  { %v275_v56 = vmul.f32 %v829_v38, %v274_v55 }
 0x2af   :  { %v280_v59 = vsel %vm250_vm3, %v275_v56, 0 }
 0x2b0   :  { %v299_v60 = vand.u32 4294901760, %v280_v59 }
 0x2b2   :  { %v300_v62 = vsub.f32 %v280_v59, %v299_v60 }
 0x2b3   :  { %v277_v0 = vpop.permute.xlu1 %276 }
 0x2b4   :  { %v297_v1 = vand.u32 4294901760, %v277_v0  ;;  %v301_v2 = vand.u32 4294901760, %v300_v62 }
 0x2b6   :  { %v324_v5 = vsub.f32 %v277_v0, %v297_v1  ;;  %298 = vmatpush.msra.mxu1 %v297_v1  ;;  %374 = vmatpush.msrb.mxu0 %v297_v1  ;;  %v302_v6 = vsub.f32 %v300_v62, %v301_v2 }
 0x2b7   :  { %378 = vmatmul.f32.vlgmr.msrb.gmra.mxu0 %v301_v2 }
 0x2b8   :  { %v325_v8 = vand.u32 4294901760, %v324_v5  ;;  %v303_v9 = vand.u32 4294901760, %v302_v6  ;;  %482 = vmatpush.xpose.msra.mxu0 %v481_v3  ;;  %351 = vmatpush.msra.mxu3 %v324_v5 }
 0x2b9   :  { %354 = vmatmul.f32.vlgmr.msra.gmra.mxu3 %v300_v62 }
 0x2ba   :  { %v326_v10 = vsub.f32 %v324_v5, %v325_v8  ;;  %452 = vmatpush.xpose.msrb.mxu3 %v451_v46  ;;  %304 = vmatmul.f32.vlgmr.msra.gmra.mxu1 %v303_v9 }
 0x2bb   :  { %400 = vmatpush.msrb.mxu1 %v325_v8 }
 0x2bc   :  { %576 = vmatpush.xpose.msrb.mxu0 %v451_v46  ;;  %v327_v12 = vand.u32 4294901760, %v326_v10 }
 0x2bd   :  { %505 = vmatpush.xpose.msra.mxu1 %v478_v51 }
 0x2be   :  { %554 = vmatpush.xpose.msra.mxu3 %v479_v57  ;;  %328 = vmatpush.msra.mxu2 %v327_v12 }
 0x2bf   :  { %330 = vmatmul.f32.vlgmr.msra.gmra.mxu2 %v299_v60  ;;  %484 = vmatmul.f32.vlgmr.msra.gmra.mxu0 %v453_v58 }
 0x2c0   :  { %422 = vmatpush.msrb.mxu2 %v297_v1 }
 0x2c1   :  { %458 = vmatmul.f32.vlgmr.msrb.gmra.mxu3 %v457_v13 }
 0x2c2   :  { %528 = vmatpush.xpose.msra.mxu2 %v451_v46  ;;  %402 = vmatmul.f32.vlgmr.msrb.gmra.mxu1 %v299_v60 }
 0x2c7   :  { %424 = vmatmul.f32.vlgmr.msrb.gmra.mxu2 %v299_v60  ;;  %578 = vmatmul.f32.vlgmr.msrb.gmra.mxu0 %v453_v58 }
 0x2c9   :  { %556 = vmatmul.f32.vlgmr.msra.gmra.mxu3 %v453_v58 }
 0x2ca   :  { %508 = vmatmul.f32.vlgmr.msra.gmra.mxu1 %v454_v63 }
 0x2cf   :  { %532 = vmatmul.f32.vlgmr.msra.gmra.mxu2 %v455_v7 }
 0x334   :  { %v379_v16 = vpop.f32.mrf.mxu0 }
 0x337   :  { %v305_v14 = vpop.f32.mrf.mxu1 }
 0x33c   :  { %v355_v15 = vpop.f32.mrf.mxu3  ;;  %v485_v26 = vpop.f32.mrf.mxu0 }
 0x33f   :  { %v403_v19 = vpop.f32.mrf.mxu1 }
 0x342   :  { %v331_v17 = vpop.f32.mrf.mxu2 }
 0x343   :  { %v332_v18 = vadd.f32 %v331_v17, %v305_v14 }
 0x344   :  { %v459_v23 = vpop.f32.mrf.mxu3  ;;  %v579_v36 = vpop.f32.mrf.mxu0 }
 0x345   :  { %v356_v20 = vadd.f32 %v355_v15, %v332_v18  ;;  %v486_v29 = vadd.f32 %v485_v26, %v459_v23 }
 0x347   :  { %v380_v21 = vadd.f32 %v379_v16, %v356_v20  ;;  %v509_v30 = vpop.f32.mrf.mxu1 }
 0x348   :  { %v510_v31 = vadd.f32 %v509_v30, %v486_v29 }
 0x349   :  { %v404_v22 = vadd.f32 %v403_v19, %v380_v21 }
 0x34a   :  { %v425_v24 = vpop.f32.mrf.mxu2 }
 0x34b   :  { %v426_v25 = vadd.f32 %v425_v24, %v404_v22 }
 0x34c   :  { %v557_v34 = vpop.f32.mrf.mxu3 }
 0x34d   :  { %428 = vst.msk [vmem:[#allocation7] sm:$0xff] %vm97_vm1, %v426_v25 }
 0x352   :  { %v533_v32 = vpop.f32.mrf.mxu2 }
 0x353   :  { %v534_v33 = vadd.f32 %v533_v32, %v510_v31 }
 0x355   :  { %v558_v35 = vadd.f32 %v557_v34, %v534_v33 }
 0x357   :  { %v580_v37 = vadd.f32 %v579_v36, %v558_v35 }
 0x359   :  { %v582_v38 = vmul.f32 0.25, %v580_v37 }
 0x35b   :  { %v583_v39 = vsel %vm93_vm2, %v582_v38, -inf }
 0x35c   :  { %v586_v40 = vsel %vm250_vm3, %v583_v39, -inf  ;;  %585 = vst.msk [vmem:[#allocation8 + $0x8] sm:$0xff] %vm250_vm3, %v583_v39 }
 0x35d   :  { %587 = vmax.xlane.f32.xlu2 %v586_v40  ;;  %789 = dma.vmem_to_hbm [thread:$0]  %s782_s25, 256, %s784_s28, [#allocation9], %s947_s29, %s947_s29, %s948_s30  }
 0x375   :  { %610 = vrot.lane.b32.xlu2 %v976_v4, %s945_s1 }
 0x3d0   :  { %v588_v41 = vpop.xlane.xlu2 %587 }
 0x3d1   :  { %v589_v42 = vsub.f32 %v583_v39, %v588_v41 }
 0x3d3   :  { %v590_v43 = vmul.f32 1.442695, %v589_v42 }
 0x3d5   :  { %832 = vpow2.f32 %v590_v43 }
 0x3d8   :  { %v611_v44 = vpop.permute.xlu2 %610 }
 0x3d9   :  { %v631_v45 = vand.u32 4294901760, %v611_v44 }
 0x3db   :  { %v833_v46 = vpop.eup %832  ;;  %v658_v47 = vsub.f32 %v611_v44, %v631_v45  ;;  %632 = vmatpush.msrb.mxu1 %v631_v45  ;;  %708 = vmatpush.msra.mxu0 %v631_v45 }
 0x3dc   :  { %v592_v27 = vsel %vm250_vm3, %v833_v46, 0.0 }
 0x3dd   :  { %v659_v28 = vand.u32 4294901760, %v658_v47  ;;  %593 = vadd.xlane.f32.xlu1 %v592_v27  ;;  %685 = vmatpush.msrb.mxu3 %v658_v47 }
 0x3df   :  { %v660_v48 = vsub.f32 %v658_v47, %v659_v28  ;;  %734 = vmatpush.msra.mxu1 %v659_v28 }
 0x3e1   :  { %v661_v49 = vand.u32 4294901760, %v660_v48 }
 0x3e3   :  { %662 = vmatpush.msrb.mxu2 %v661_v49 }
 0x3e5   :  { %756 = vmatpush.msra.mxu2 %v631_v45 }
 0x450   :  { %v594_v4 = vpop.xlane.xlu1 %593 }
 0x451   :  { %834 = vrcp.f32 %v594_v4  ;;  %v606_v53 = vand.u32 2147483648, %v594_v4  ;;  %v604_v55 = vand.u32 2147483647, %v594_v4  ;;  %vm600_vm9 = vweird.f32 %v594_v4 }
 0x453   :  { %v607_v57 = vor.u32 1.1754944e-38, %v606_v53  ;;  %vm605_vm11 = vcmp.eq.f32.partialorder %v604_v55, 8.507059e+37 }
 0x457   :  { %v835_v50 = vpop.eup %834 }
 0x458   :  { %v596_v51 = vmul.f32 %v835_v50, %v594_v4  ;;  %vm601_vm8 = vweird.f32 %v835_v50 }
 0x459   :  { %vm602_vm10 = vmor %vm600_vm9, %vm601_vm8 }
 0x45a   :  { %v597_v52 = vsub.f32 1.0, %v596_v51 }
 0x45c   :  { %v598_v54 = vmul.f32 %v835_v50, %v597_v52 }
 0x45e   :  { %v599_v56 = vadd.f32 %v835_v50, %v598_v54 }
 0x460   :  { %v603_v58 = vsel %vm602_vm10, %v835_v50, %v599_v56 }
 0x461   :  { %v608_v59 = vsel %vm605_vm11, %v607_v57, %v603_v58 }
 0x462   :  { %v609_v60 = vmul.f32 %v833_v46, %v608_v59 }
 0x464   :  { %v614_v61 = vsel %vm250_vm3, %v609_v60, 0 }
 0x465   :  { %v633_v62 = vand.u32 4294901760, %v614_v61 }
 0x467   :  { %664 = vmatmul.f32.vlgmr.msrb.gmra.mxu2 %v633_v62  ;;  %v634_v63 = vsub.f32 %v614_v61, %v633_v62 }
 0x469   :  { %688 = vmatmul.f32.vlgmr.msrb.gmra.mxu3 %v634_v63  ;;  %v635_v0 = vand.u32 4294901760, %v634_v63 }
 0x46b   :  { %712 = vmatmul.f32.vlgmr.msra.gmra.mxu0 %v635_v0  ;;  %v636_v1 = vsub.f32 %v634_v63, %v635_v0 }
 0x46d   :  { %v637_v2 = vand.u32 4294901760, %v636_v1 }
 0x46f   :  { %638 = vmatmul.f32.vlgmr.msrb.gmra.mxu1 %v637_v2  ;;  %758 = vmatmul.f32.vlgmr.msra.gmra.mxu2 %v633_v62 }
 0x477   :  { %736 = vmatmul.f32.vlgmr.msra.gmra.mxu1 %v633_v62 }
 0x4e8   :  { %v713_v9 = vpop.f32.mrf.mxu0 }
 0x4ea   :  { %v665_v3 = vpop.f32.mrf.mxu2 }
 0x4ec   :  { %v639_v5 = vpop.f32.mrf.mxu1  ;;  %v689_v7 = vpop.f32.mrf.mxu3 }
 0x4ed   :  { %v666_v6 = vadd.f32 %v665_v3, %v639_v5 }
 0x4ef   :  { %v690_v8 = vadd.f32 %v689_v7, %v666_v6 }
 0x4f1   :  { %v714_v10 = vadd.f32 %v713_v9, %v690_v8 }
 0x4f2   :  { %v759_v13 = vpop.f32.mrf.mxu2 }
 0x4f4   :  { %v737_v11 = vpop.f32.mrf.mxu1 }
 0x4f5   :  { %v738_v12 = vadd.f32 %v737_v11, %v714_v10 }
 0x4f7   :  { %v760_v14 = vadd.f32 %v759_v13, %v738_v12 }
 0x4f9   :  { %763 = vst.msk [vmem:[#allocation7 + $0x8] sm:$0xff] %vm97_vm1, %v760_v14 }
 0x4fa   :  { %776 = dma.vmem_to_hbm [thread:$0]  %s769_s5, 256, %s771_s8, [#allocation4], %s947_s29, %s947_s29, %s948_s30  }
 0x4fb   :  { %936 = dma.done.wait [#allocation4], 256  }
 0x4fc   :  { %937 = vsyncadd [#allocation4], 4294967040 }
 0x4fd   :  { %938 = dma.done.wait [#allocation9], 256  }
 0x4fe   :  { %939 = vsyncadd [#allocation9], 4294967040 }
 0x4ff   :  { %798 = vsyncpa [#allocation3], 1 }
 0x500   :  { %799 = vsyncpa [#allocation6], 1 }
 0x501   :  { %800 = vsyncpa [#allocation4], 1 }
 0x502   :  { %801 = vsyncpa [#allocation9], 1 }

</bundles_post_ra>
